<compile_context>
chip_gen: v7x
topology: tpu7x:2x2x1
jax: 0.10.0
libtpu: 0.0.40
codegen_flags: <defaults>
</compile_context>

<pallas_src>
from functools import partial

import jax
import jax.numpy as jnp
from jax.experimental import pallas as pl
from jax.experimental.pallas import tpu as pltpu

EPS = 1e-5
LANE = 128


def _round_up(n, m):
    return ((n + m - 1) // m) * m


def _pad_to(a, target_shape):
    return jnp.pad(a, [(0, t - s) for s, t in zip(a.shape, target_shape)])


def basic_block_kernel(x_ref, w1t_ref, bn1_ref, w2t_ref, bn2_ref, o_ref, *, mxu_dtype):
    x = x_ref[0]                                       # (B, Finp) f32; residual stays f32

    # fc1: x @ W1^T   (bias omitted: cancelled exactly by training-mode BN mean sub)
    h = jnp.dot(x.astype(mxu_dtype), w1t_ref[...],     # weights pre-cast to mxu_dtype
                preferred_element_type=jnp.float32)    # (B, Midp) f32 accumulation

    # bn1 folded into one per-feature affine: scale = g*rsqrt(var+eps), shift = b - mu*scale
    bn1 = bn1_ref[...]                                 # row 0: gamma, row 1: beta
    mu1 = jnp.mean(h, axis=0, keepdims=True)
    d1 = h - mu1
    var1 = jnp.mean(d1 * d1, axis=0, keepdims=True)    # two-pass form: no cancellation
    scale1 = bn1[0:1, :] * jax.lax.rsqrt(var1 + EPS)
    shift1 = bn1[1:2, :] - mu1 * scale1
    h = jnp.maximum(h * scale1 + shift1, 0.0)          # bn1 + relu

    # fc2: h @ W2^T   (bias omitted, same cancellation)
    h2 = jnp.dot(h.astype(mxu_dtype), w2t_ref[...],
                 preferred_element_type=jnp.float32)   # (B, Foutp) f32

    # bn2 folded affine
    bn2 = bn2_ref[...]
    mu2 = jnp.mean(h2, axis=0, keepdims=True)
    d2 = h2 - mu2
    var2 = jnp.mean(d2 * d2, axis=0, keepdims=True)
    scale2 = bn2[0:1, :] * jax.lax.rsqrt(var2 + EPS)
    shift2 = bn2[1:2, :] - mu2 * scale2

    # bn2 + identity shortcut + relu; lane-dense (128-multiple) full-width store
    o_ref[0] = jnp.maximum(h2 * scale2 + shift2 + x, 0.0)


def basic_block_grouped(xg, params, *, mxu_dtype=jnp.bfloat16):
    """xg: (G, B, F). Applies the BasicBlock forward independently per group (each
    group gets its own BatchNorm batch statistics) in ONE pallas_call: weights are
    DMA'd once (constant index_map) and the group axis is 'parallel' so it shards
    across v7x's two TensorCores. Call under jax.jit so the pad/transpose/cast glue
    fuses into the same XLA program."""
    w1, b1, g1, be1, w2, b2, g2, be2 = params          # b1/b2 unused: cancelled by BN
    G, B, Fin = xg.shape
    Mid = w1.shape[0]
    Fout = w2.shape[0]
    assert Fin == Fout, "identity shortcut requires in_features == out_features"

    sub = 16 if jnp.dtype(mxu_dtype) == jnp.dtype(jnp.bfloat16) else 8
    Finp = _round_up(Fin, LANE)                        # residual / output lane width
    Midp = _round_up(Mid, sub)                         # contraction dim: sublane multiple only
    Foutp = _round_up(Fout, LANE)

    # Lane-padded operands: padded lanes stay exactly 0 through matmul, BN
    # (gamma=beta=0), residual and relu, and are sliced off after the call.
    xp = _pad_to(xg.astype(jnp.float32), (G, B, Finp))
    w1t = _pad_to(jnp.transpose(w1).astype(jnp.float32), (Finp, Midp)).astype(mxu_dtype)
    w2t = _pad_to(jnp.transpose(w2).astype(jnp.float32), (Midp, Foutp)).astype(mxu_dtype)
    bn1 = _pad_to(jnp.stack([g1, be1]).astype(jnp.float32), (2, Midp))
    bn2 = _pad_to(jnp.stack([g2, be2]).astype(jnp.float32), (2, Foutp))

    outp = pl.pallas_call(
        partial(basic_block_kernel, mxu_dtype=mxu_dtype),
        out_shape=jax.ShapeDtypeStruct((G, B, Foutp), jnp.float32),
        grid=(G,),
        in_specs=[
            pl.BlockSpec((1, B, Finp), lambda g: (g, 0, 0)),
            pl.BlockSpec((Finp, Midp), lambda g: (0, 0)),   # constant index -> DMA'd once
            pl.BlockSpec((2, Midp), lambda g: (0, 0)),
            pl.BlockSpec((Midp, Foutp), lambda g: (0, 0)),
            pl.BlockSpec((2, Foutp), lambda g: (0, 0)),
        ],
        out_specs=pl.BlockSpec((1, B, Foutp), lambda g: (g, 0, 0)),
        compiler_params=pltpu.CompilerParams(
            dimension_semantics=("parallel",)),            # v7x megacore; no-op on v5e/v6e
    )(xp, w1t, bn1, w2t, bn2)
    return outp[:, :, :Fout]


def basic_block(x, params, *, mxu_dtype=jnp.bfloat16):
    """x: (B, in_features). Single application == one group."""
    return basic_block_grouped(x[None], params, mxu_dtype=mxu_dtype)[0]


def init_params(key, in_features, mid_features, out_features):
    """Deterministic parameter init (PyTorch-like uniform fan-in bounds)."""
    k = jax.random.split(key, 4)
    lim1 = 1.0 / jnp.sqrt(in_features)
    lim2 = 1.0 / jnp.sqrt(mid_features)
    w1 = jax.random.uniform(k[0], (mid_features, in_features), jnp.float32, -lim1, lim1)
    b1 = jax.random.uniform(k[1], (mid_features,), jnp.float32, -lim1, lim1)
    w2 = jax.random.uniform(k[2], (out_features, mid_features), jnp.float32, -lim2, lim2)
    b2 = jax.random.uniform(k[3], (out_features,), jnp.float32, -lim2, lim2)
    # BatchNorm1d affine params: gamma=1, beta=0 (PyTorch default init).
    g1 = jnp.ones((mid_features,), jnp.float32)
    be1 = jnp.zeros((mid_features,), jnp.float32)
    g2 = jnp.ones((out_features,), jnp.float32)
    be2 = jnp.zeros((out_features,), jnp.float32)
    return (w1, b1, g1, be1, w2, b2, g2, be2)


def reference(x, params):
    w1, b1, g1, be1, w2, b2, g2, be2 = params
    h = x @ w1.T + b1
    mu, var = jnp.mean(h, 0), jnp.var(h, 0)
    h = jnp.maximum((h - mu) / jnp.sqrt(var + EPS) * g1 + be1, 0.0)
    h2 = h @ w2.T + b2
    mu2, var2 = jnp.mean(h2, 0), jnp.var(h2, 0)
    h2 = (h2 - mu2) / jnp.sqrt(var2 + EPS) * g2 + be2
    return jnp.maximum(h2 + x, 0.0)


if __name__ == "__main__":
    B, IN, MID, OUT = 8, 32, 64, 32   # identity shortcut => IN == OUT
    key = jax.random.PRNGKey(0)
    kx, kp, kg = jax.random.split(key, 3)
    x = jax.random.normal(kx, (B, IN), jnp.float32)
    params = init_params(kp, IN, MID, OUT)
    ref = reference(x, params)

    # f32 MXU validation path: tight tolerance vs the f32 reference.
    out_f32 = jax.block_until_ready(
        jax.jit(partial(basic_block, mxu_dtype=jnp.float32))(x, params))
    assert out_f32.shape == (B, OUT)
    assert jnp.allclose(out_f32, ref, atol=1e-4, rtol=1e-4), "f32 mismatch vs reference"

    # Default bf16-MXU path (f32 accumulation): looser tolerance.
    out_bf16 = jax.block_until_ready(jax.jit(basic_block)(x, params))
    assert out_bf16.shape == (B, OUT)
    assert jnp.allclose(out_bf16, ref, atol=7e-2, rtol=7e-2), "bf16 mismatch vs reference"

    # Grouped path: G independent batches in one launch, weights DMA'd once.
    G = 3
    xg = jax.random.normal(kg, (G, B, IN), jnp.float32)
    outg = jax.block_until_ready(
        jax.jit(partial(basic_block_grouped, mxu_dtype=jnp.float32))(xg, params))
    refg = jnp.stack([reference(xg[i], params) for i in range(G)])
    assert outg.shape == (G, B, OUT)
    assert jnp.allclose(outg, refg, atol=1e-4, rtol=1e-4), "grouped mismatch vs reference"

    print("KERNEL_OK")
</pallas_src>

<mosaic_0001>
module attributes {stable_mosaic.version = 11 : i64} {
  func.func @basic_block_kernel(%arg0: i32, %arg1: memref<1x8x128xf32, #tpu.memory_space<vmem>>, %arg2: memref<128x64xf32, #tpu.memory_space<vmem>>, %arg3: memref<2x64xf32, #tpu.memory_space<vmem>>, %arg4: memref<64x128xf32, #tpu.memory_space<vmem>>, %arg5: memref<2x128xf32, #tpu.memory_space<vmem>>, %arg6: memref<1x8x128xf32, #tpu.memory_space<vmem>>) attributes {dimension_semantics = [#tpu.dimension_semantics<parallel>], iteration_bounds = array<i64: 1>, scalar_prefetch = 0 : i64, scratch_operands = 0 : i64, tpu.core_type = #tpu.core_type<tc>, window_params = [{transform_indices = @transform_0, window_bounds = array<i64: 1, 8, 128>}, {pipeline_mode = #tpu.pipeline_mode<synchronous>, transform_indices = @transform_1, window_bounds = array<i64: 128, 64>}, {pipeline_mode = #tpu.pipeline_mode<synchronous>, transform_indices = @transform_2, window_bounds = array<i64: 2, 64>}, {pipeline_mode = #tpu.pipeline_mode<synchronous>, transform_indices = @transform_3, window_bounds = array<i64: 64, 128>}, {pipeline_mode = #tpu.pipeline_mode<synchronous>, transform_indices = @transform_4, window_bounds = array<i64: 2, 128>}, {transform_indices = @transform_5, window_bounds = array<i64: 1, 8, 128>}]} {
    %c0 = arith.constant 0 : index
    %c0_0 = arith.constant 0 : index
    %c0_1 = arith.constant 0 : index
    %0 = vector.load %arg1[%c0, %c0_0, %c0_1] : memref<1x8x128xf32, #tpu.memory_space<vmem>>, vector<1x8x128xf32>
    %1 = vector.shape_cast %0 : vector<1x8x128xf32> to vector<8x128xf32>
    %c0_2 = arith.constant 0 : index
    %c0_3 = arith.constant 0 : index
    %2 = vector.load %arg2[%c0_2, %c0_3] : memref<128x64xf32, #tpu.memory_space<vmem>>, vector<128x64xf32>
    %cst = arith.constant dense<0.000000e+00> : vector<8x64xf32>
    %3 = tpu.matmul %1, %2, %cst {dimension_numbers = #tpu.dot_dimension_numbers<[1], [0], [0], [1], [0, 0, 1, 1], [], []>} : vector<8x128xf32>, vector<128x64xf32>, vector<8x64xf32> -> vector<8x64xf32>
    %c0_4 = arith.constant 0 : index
    %c0_5 = arith.constant 0 : index
    %4 = vector.load %arg3[%c0_4, %c0_5] : memref<2x64xf32, #tpu.memory_space<vmem>>, vector<2x64xf32>
    %cst_6 = arith.constant dense<0.000000e+00> : vector<64xf32>
    %5 = vector.multi_reduction <add>, %3, %cst_6 [0] : vector<8x64xf32> to vector<64xf32>
    %6 = vector.shape_cast %5 : vector<64xf32> to vector<1x64xf32>
    %cst_7 = arith.constant 8.000000e+00 : f32
    %7 = vector.broadcast %cst_7 : f32 to vector<1x64xf32>
    %8 = arith.divf %6, %7 : vector<1x64xf32>
    %9 = vector.broadcast %8 : vector<1x64xf32> to vector<8x64xf32>
    %10 = arith.subf %3, %9 : vector<8x64xf32>
    %11 = arith.mulf %10, %10 : vector<8x64xf32>
    %cst_8 = arith.constant dense<0.000000e+00> : vector<64xf32>
    %12 = vector.multi_reduction <add>, %11, %cst_8 [0] : vector<8x64xf32> to vector<64xf32>
    %13 = vector.shape_cast %12 : vector<64xf32> to vector<1x64xf32>
    %cst_9 = arith.constant 8.000000e+00 : f32
    %14 = vector.broadcast %cst_9 : f32 to vector<1x64xf32>
    %15 = arith.divf %13, %14 : vector<1x64xf32>
    %16 = vector.extract_strided_slice %4 {offsets = [0, 0], sizes = [1, 64], strides = [1, 1]} : vector<2x64xf32> to vector<1x64xf32>
    %cst_10 = arith.constant 9.99999974E-6 : f32
    %17 = vector.broadcast %cst_10 : f32 to vector<1x64xf32>
    %18 = arith.addf %15, %17 : vector<1x64xf32>
    %19 = math.rsqrt %18 : vector<1x64xf32>
    %20 = arith.mulf %16, %19 : vector<1x64xf32>
    %21 = vector.extract_strided_slice %4 {offsets = [1, 0], sizes = [1, 64], strides = [1, 1]} : vector<2x64xf32> to vector<1x64xf32>
    %22 = arith.mulf %8, %20 : vector<1x64xf32>
    %23 = arith.subf %21, %22 : vector<1x64xf32>
    %24 = vector.broadcast %20 : vector<1x64xf32> to vector<8x64xf32>
    %25 = arith.mulf %3, %24 : vector<8x64xf32>
    %26 = vector.broadcast %23 : vector<1x64xf32> to vector<8x64xf32>
    %27 = arith.addf %25, %26 : vector<8x64xf32>
    %cst_11 = arith.constant 0.000000e+00 : f32
    %28 = vector.broadcast %cst_11 : f32 to vector<8x64xf32>
    %29 = arith.maximumf %27, %28 : vector<8x64xf32>
    %c0_12 = arith.constant 0 : index
    %c0_13 = arith.constant 0 : index
    %30 = vector.load %arg4[%c0_12, %c0_13] : memref<64x128xf32, #tpu.memory_space<vmem>>, vector<64x128xf32>
    %cst_14 = arith.constant dense<0.000000e+00> : vector<8x128xf32>
    %31 = tpu.matmul %29, %30, %cst_14 {dimension_numbers = #tpu.dot_dimension_numbers<[1], [0], [0], [1], [0, 0, 1, 1], [], []>} : vector<8x64xf32>, vector<64x128xf32>, vector<8x128xf32> -> vector<8x128xf32>
    %c0_15 = arith.constant 0 : index
    %c0_16 = arith.constant 0 : index
    %32 = vector.load %arg5[%c0_15, %c0_16] : memref<2x128xf32, #tpu.memory_space<vmem>>, vector<2x128xf32>
    %cst_17 = arith.constant dense<0.000000e+00> : vector<128xf32>
    %33 = vector.multi_reduction <add>, %31, %cst_17 [0] : vector<8x128xf32> to vector<128xf32>
    %34 = vector.shape_cast %33 : vector<128xf32> to vector<1x128xf32>
    %cst_18 = arith.constant 8.000000e+00 : f32
    %35 = vector.broadcast %cst_18 : f32 to vector<1x128xf32>
    %36 = arith.divf %34, %35 : vector<1x128xf32>
    %37 = vector.broadcast %36 : vector<1x128xf32> to vector<8x128xf32>
    %38 = arith.subf %31, %37 : vector<8x128xf32>
    %39 = arith.mulf %38, %38 : vector<8x128xf32>
    %cst_19 = arith.constant dense<0.000000e+00> : vector<128xf32>
    %40 = vector.multi_reduction <add>, %39, %cst_19 [0] : vector<8x128xf32> to vector<128xf32>
    %41 = vector.shape_cast %40 : vector<128xf32> to vector<1x128xf32>
    %cst_20 = arith.constant 8.000000e+00 : f32
    %42 = vector.broadcast %cst_20 : f32 to vector<1x128xf32>
    %43 = arith.divf %41, %42 : vector<1x128xf32>
    %44 = vector.extract_strided_slice %32 {offsets = [0, 0], sizes = [1, 128], strides = [1, 1]} : vector<2x128xf32> to vector<1x128xf32>
    %cst_21 = arith.constant 9.99999974E-6 : f32
    %45 = vector.broadcast %cst_21 : f32 to vector<1x128xf32>
    %46 = arith.addf %43, %45 : vector<1x128xf32>
    %47 = math.rsqrt %46 : vector<1x128xf32>
    %48 = arith.mulf %44, %47 : vector<1x128xf32>
    %49 = vector.extract_strided_slice %32 {offsets = [1, 0], sizes = [1, 128], strides = [1, 1]} : vector<2x128xf32> to vector<1x128xf32>
    %50 = arith.mulf %36, %48 : vector<1x128xf32>
    %51 = arith.subf %49, %50 : vector<1x128xf32>
    %52 = vector.broadcast %48 : vector<1x128xf32> to vector<8x128xf32>
    %53 = arith.mulf %31, %52 : vector<8x128xf32>
    %54 = vector.broadcast %51 : vector<1x128xf32> to vector<8x128xf32>
    %55 = arith.addf %53, %54 : vector<8x128xf32>
    %56 = arith.addf %55, %1 : vector<8x128xf32>
    %cst_22 = arith.constant 0.000000e+00 : f32
    %57 = vector.broadcast %cst_22 : f32 to vector<8x128xf32>
    %58 = arith.maximumf %56, %57 : vector<8x128xf32>
    %c0_23 = arith.constant 0 : index
    %c0_24 = arith.constant 0 : index
    %c0_25 = arith.constant 0 : index
    %59 = vector.load %arg6[%c0_23, %c0_24, %c0_25] : memref<1x8x128xf32, #tpu.memory_space<vmem>>, vector<1x8x128xf32>
    %60 = vector.shape_cast %59 : vector<1x8x128xf32> to vector<8x128xf32>
    %61 = vector.shape_cast %58 : vector<8x128xf32> to vector<1x8x128xf32>
    tpu.vector_store %arg6[%c0_23, %c0_24, %c0_25], %61 {strides = array<i32>} : memref<1x8x128xf32, #tpu.memory_space<vmem>>, vector<1x8x128xf32>,
    return
  }
  func.func @transform_0(%arg0: i32) -> (i32, i32, i32) {
    %c0_i32 = arith.constant 0 : i32
    %c0_i32_0 = arith.constant 0 : i32
    %c0_i32_1 = arith.constant 0 : i32
    return %arg0, %c0_i32, %c0_i32_0 : i32, i32, i32
  }
  func.func @transform_1(%arg0: i32) -> (i32, i32) {
    %c0_i32 = arith.constant 0 : i32
    %c0_i32_0 = arith.constant 0 : i32
    %c0_i32_1 = arith.constant 0 : i32
    return %c0_i32, %c0_i32_0 : i32, i32
  }
  func.func @transform_2(%arg0: i32) -> (i32, i32) {
    %c0_i32 = arith.constant 0 : i32
    %c0_i32_0 = arith.constant 0 : i32
    %c0_i32_1 = arith.constant 0 : i32
    return %c0_i32, %c0_i32_0 : i32, i32
  }
  func.func @transform_3(%arg0: i32) -> (i32, i32) {
    %c0_i32 = arith.constant 0 : i32
    %c0_i32_0 = arith.constant 0 : i32
    %c0_i32_1 = arith.constant 0 : i32
    return %c0_i32, %c0_i32_0 : i32, i32
  }
  func.func @transform_4(%arg0: i32) -> (i32, i32) {
    %c0_i32 = arith.constant 0 : i32
    %c0_i32_0 = arith.constant 0 : i32
    %c0_i32_1 = arith.constant 0 : i32
    return %c0_i32, %c0_i32_0 : i32, i32
  }
  func.func @transform_5(%arg0: i32) -> (i32, i32, i32) {
    %c0_i32 = arith.constant 0 : i32
    %c0_i32_0 = arith.constant 0 : i32
    %c0_i32_1 = arith.constant 0 : i32
    return %arg0, %c0_i32, %c0_i32_0 : i32, i32, i32
  }
}

</mosaic_0001>

<bundles_post_ra>
// kernel: basic_block.1
= control target key start
LH: loop header
LB: loop body
LE: loop exit
PB: predicated region body
PF: predicated region fallthrough
CT: control target
= control target key end

     0   :  { %v394_v0 = vmov 0.0|0.0   ;;  %vm395_vm0 = vmmov 0   ;;  %v396_v4 = vmov 0.0   ;;  %vm108_vm1 = vcmask 523264   ;;  %s530_s1 = inlined_call_operand.vmem [shape: f32[128,64], index: 1, kind: input, shape index: {}]   ;;  %s531_s0 = inlined_call_operand.vmem [shape: f32[1,8,128], index: 0, kind: input, shape index: {}]   ;;  %s532_s3 = inlined_call_operand.vmem [shape: f32[64,128], index: 3, kind: input, shape index: {}]   ;;  %s533_s2 = inlined_call_operand.vmem [shape: f32[2,64], index: 2, kind: input, shape index: {}]   ;;  %s534_s4 = inlined_call_operand.vmem [shape: f32[2,128], index: 4, kind: input, shape index: {}]   ;;  %s535_s5 = inlined_call_operand.vmem [shape: f32[1,8,128], index: 5, kind: output, shape index: {}]  }
   0x1   :  { %351 = vmatprep.subr.bf16.mxu0 %v394_v0  ;;  %v21_v1 = vld [vmem:[%s530_s1] sm:$0xff]  ;;  %v22_v2 = vld [vmem:[%s530_s1 + $0x8] sm:$0xff]  ;;  %v23_v3 = vld [vmem:[%s530_s1 + $0x10] sm:$0xff]  ;;  %329 = vmatprep.mubr.msk.f32.mxu0 %vm395_vm0, %v396_v4  ;;  %v136_v60 = vlaneseq }
   0x2   :  { %v352_v5 = vpack.c.bf16 %v22_v2, %v21_v1  ;;  %v24_v6 = vld [vmem:[%s530_s1 + $0x18] sm:$0xff]  ;;  %375 = vmatprep.subr.bf16.mxu1 %v394_v0  ;;  %348 = vmatprep.mubr.msk.f32.mxu1 %vm395_vm0, %v396_v4  ;;  %v25_v8 = vld [vmem:[%s530_s1 + $0x20] sm:$0xff]  ;;  %v26_v9 = vld [vmem:[%s530_s1 + $0x28] sm:$0xff] }
   0x3   :  { %v355_v7 = vpack.c.bf16 %v24_v6, %v23_v3  ;;  %v358_v10 = vpack.c.bf16 %v26_v9, %v25_v8  ;;  %v27_v11 = vld [vmem:[%s530_s1 + $0x30] sm:$0xff]  ;;  %v28_v12 = vld [vmem:[%s530_s1 + $0x38] sm:$0xff]  ;;  %v29_v14 = vld [vmem:[%s530_s1 + $0x40] sm:$0xff]  ;;  %v137_v61 = vshrl.u32 %v136_v60, 7 }
   0x4   :  { %353 = vmatpush3.bf16.msra.mxu0 %v352_v5  ;;  %v361_v13 = vpack.c.bf16 %v28_v12, %v27_v11  ;;  %v30_v15 = vld [vmem:[%s530_s1 + $0x48] sm:$0xff]  ;;  %v31_v17 = vld [vmem:[%s530_s1 + $0x50] sm:$0xff]  ;;  %v32_v18 = vld [vmem:[%s530_s1 + $0x58] sm:$0xff] }
   0x5   :  { %354 = vmatprep.subr.bf16.mxu0 %v394_v0  ;;  %v364_v16 = vpack.c.bf16 %v30_v15, %v29_v14  ;;  %v367_v19 = vpack.c.bf16 %v32_v18, %v31_v17  ;;  %v33_v20 = vld [vmem:[%s530_s1 + $0x60] sm:$0xff]  ;;  %v34_v21 = vld [vmem:[%s530_s1 + $0x68] sm:$0xff]  ;;  %v35_v23 = vld [vmem:[%s530_s1 + $0x70] sm:$0xff]  ;;  %v138_v1 = vsub.s32 0, %v137_v61  ;;  %v143_v5 = vsub.s32 1, %v137_v61 }
   0x6   :  { %v370_v22 = vpack.c.bf16 %v34_v21, %v33_v20  ;;  %v36_v24 = vld [vmem:[%s530_s1 + $0x78] sm:$0xff]  ;;  %v487_v26 = vld [vmem:[%s531_s0] sm:$0xff]  ;;  %v148_v28 = vld [vmem:[%s532_s3 + $0x8] sm:$0xff] }
   0x7   :  { %v373_v25 = vpack.c.bf16 %v36_v24, %v35_v23  ;;  %v147_v27 = vld [vmem:[%s532_s3] sm:$0xff]  ;;  %v149_v30 = vld [vmem:[%s532_s3 + $0x10] sm:$0xff]  ;;  %v150_v31 = vld [vmem:[%s532_s3 + $0x18] sm:$0xff] }
   0x8   :  { %356 = vmatpush3.bf16.msra.mxu0 %v355_v7  ;;  %v376_v29 = vpack.c.bf16 %v148_v28, %v147_v27  ;;  %v379_v32 = vpack.c.bf16 %v150_v31, %v149_v30  ;;  %v151_v33 = vld [vmem:[%s532_s3 + $0x20] sm:$0xff]  ;;  %v152_v34 = vld [vmem:[%s532_s3 + $0x28] sm:$0xff]  ;;  %v153_v36 = vld [vmem:[%s532_s3 + $0x30] sm:$0xff] }
   0x9   :  { %357 = vmatprep.subr.bf16.mxu0 %v394_v0  ;;  %v382_v35 = vpack.c.bf16 %v152_v34, %v151_v33  ;;  %v154_v37 = vld [vmem:[%s532_s3 + $0x38] sm:$0xff]  ;;  %v107_v62 = vld [vmem:[%s533_s2] sm:$0x3] }
   0xa   :  { %377 = vmatpush3.bf16.msra.mxu1 %v376_v29  ;;  %v385_v38 = vpack.c.bf16 %v154_v37, %v153_v36  ;;  %v228_v31 = vld [vmem:[%s534_s4] sm:$0x3] }
   0xb   :  { %378 = vmatprep.subr.bf16.mxu1 %v394_v0 }
   0xc   :  { %359 = vmatpush3.bf16.msra.mxu0 %v358_v10 }
   0xd   :  { %360 = vmatprep.subr.bf16.mxu0 %v394_v0 }
   0xe   :  { %380 = vmatpush3.bf16.msra.mxu1 %v379_v32 }
   0xf   :  { %381 = vmatprep.subr.bf16.mxu1 %v394_v0 }
  0x10   :  { %362 = vmatpush3.bf16.msra.mxu0 %v361_v13 }
  0x11   :  { %363 = vmatprep.subr.bf16.mxu0 %v394_v0 }
  0x12   :  { %383 = vmatpush3.bf16.msra.mxu1 %v382_v35 }
  0x13   :  { %384 = vmatprep.subr.bf16.mxu1 %v394_v0 }
  0x14   :  { %365 = vmatpush3.bf16.msra.mxu0 %v364_v16 }
  0x15   :  { %366 = vmatprep.subr.bf16.mxu0 %v394_v0 }
  0x16   :  { %386 = vmatpush3.bf16.msra.mxu1 %v385_v38 }
  0x18   :  { %368 = vmatpush3.bf16.msra.mxu0 %v367_v19 }
  0x19   :  { %369 = vmatprep.subr.bf16.mxu0 %v394_v0 }
  0x1c   :  { %371 = vmatpush3.bf16.msra.mxu0 %v370_v22 }
  0x1d   :  { %372 = vmatprep.subr.bf16.mxu0 %v394_v0 }
  0x20   :  { %374 = vmatpush3.bf16.msra.mxu0 %v373_v25 }
  0x23   :  { %330 = vmatmul.mubr.f32.vlgmr.msra.gmra.mrb[0].mxu0 %v487_v26 }
  0xf6   :  { %v103_v39 = vpop.f32.mrb[0].mxu0 }
  0xf7   :  { %v109_v40 = vsel %vm108_vm1, %v103_v39, 0.0  ;;  %v331_v41 = vpop.f32.mrb[1].mxu0 }
  0xf8   :  { %v110_v42 = vrot.slane %v109_v40, 4 }
  0xfa   :  { %v111_v43 = vadd.f32 %v110_v42, %v109_v40 }
  0xfc   :  { %v112_v44 = vrot.slane %v111_v43, 2 }
  0xfe   :  { %v113_v45 = vadd.f32 %v112_v44, %v111_v43 }
 0x100   :  { %v114_v46 = vrot.slane %v113_v45, 1 }
 0x102   :  { %v115_v47 = vadd.f32 %v114_v46, %v113_v45 }
 0x104   :  { %v117_v48 = vmul.f32 0.125, %v115_v47 }
 0x106   :  { %v118_v49 = vsub.f32 %v103_v39, %v117_v48 }
 0x108   :  { %v119_v50 = vmul.f32 %v118_v49, %v118_v49 }
 0x10a   :  { %v120_v51 = vsel %vm108_vm1, %v119_v50, 0.0 }
 0x10b   :  { %v121_v52 = vrot.slane %v120_v51, 4 }
 0x10d   :  { %v122_v53 = vadd.f32 %v121_v52, %v120_v51 }
 0x10f   :  { %v123_v54 = vrot.slane %v122_v53, 2 }
 0x111   :  { %v124_v55 = vadd.f32 %v123_v54, %v122_v53 }
 0x113   :  { %v125_v56 = vrot.slane %v124_v55, 1 }
 0x115   :  { %v126_v57 = vadd.f32 %v125_v56, %v124_v55 }
 0x117   :  { %v127_v58 = vmul.f32 0.125, %v126_v57 }
 0x119   :  { %v128_v59 = vadd.f32 1e-05, %v127_v58 }
 0x11b   :  { %390 = vrsqrt.f32 %v128_v59 }
 0x125   :  { %v391_v63 = vpop.eup %390 }
 0x126   :  { %v130_v0 = vmul.f32 %v391_v63, %v107_v62 }
 0x128   :  { %v131_v2 = vmul.f32 %v130_v0, %v117_v48  ;;  %v139_v4 = vrot.slane %v130_v0, %v138_v1 }
 0x12a   :  { %v133_v3 = vrot.slane %v131_v2, 7  ;;  %v140_v7 = vmul.f32 %v139_v4, %v103_v39 }
 0x12c   :  { %v135_v6 = vsub.f32 %v107_v62, %v133_v3 }
 0x12e   :  { %v144_v8 = vrot.slane %v135_v6, %v143_v5 }
 0x130   :  { %v145_v9 = vadd.f32 %v144_v8, %v140_v7 }
 0x132   :  { %v146_v10 = vmax.f32 %v145_v9, 0.0 }
 0x134   :  { %349 = vmatmul.mubr.msk.f32.vlgmr.msra.gmra.mrb[0].mxu1 %vm108_vm1, %v146_v10 }
 0x207   :  { %v224_v11 = vpop.f32.mrb[0].mxu1 }
 0x208   :  { %v229_v12 = vrot.slane %v224_v11, 4  ;;  %v350_v13 = vpop.f32.mrb[1].mxu1 }
 0x20a   :  { %v230_v14 = vadd.f32 %v229_v12, %v224_v11 }
 0x20c   :  { %v231_v15 = vrot.slane %v230_v14, 2 }
 0x20e   :  { %v232_v16 = vadd.f32 %v231_v15, %v230_v14 }
 0x210   :  { %v233_v17 = vrot.slane %v232_v16, 1 }
 0x212   :  { %v234_v18 = vadd.f32 %v233_v17, %v232_v16 }
 0x214   :  { %v235_v19 = vmul.f32 0.125, %v234_v18 }
 0x216   :  { %v236_v20 = vsub.f32 %v224_v11, %v235_v19 }
 0x218   :  { %v237_v21 = vmul.f32 %v236_v20, %v236_v20 }
 0x21a   :  { %v238_v22 = vrot.slane %v237_v21, 4 }
 0x21c   :  { %v239_v23 = vadd.f32 %v238_v22, %v237_v21 }
 0x21e   :  { %v240_v24 = vrot.slane %v239_v23, 2 }
 0x220   :  { %v241_v25 = vadd.f32 %v240_v24, %v239_v23 }
 0x222   :  { %v242_v27 = vrot.slane %v241_v25, 1 }
 0x224   :  { %v243_v28 = vadd.f32 %v242_v27, %v241_v25 }
 0x226   :  { %v244_v29 = vmul.f32 0.125, %v243_v28 }
 0x228   :  { %v245_v30 = vadd.f32 1e-05, %v244_v29 }
 0x22a   :  { %392 = vrsqrt.f32 %v245_v30 }
 0x234   :  { %v393_v32 = vpop.eup %392 }
 0x235   :  { %v247_v33 = vmul.f32 %v393_v32, %v228_v31 }
 0x237   :  { %v248_v34 = vmul.f32 %v247_v33, %v235_v19  ;;  %v256_v36 = vrot.slane %v247_v33, %v138_v1 }
 0x239   :  { %v250_v35 = vrot.slane %v248_v34, 7  ;;  %v257_v38 = vmul.f32 %v256_v36, %v224_v11 }
 0x23b   :  { %v252_v37 = vsub.f32 %v228_v31, %v250_v35 }
 0x23d   :  { %v261_v39 = vrot.slane %v252_v37, %v143_v5 }
 0x23f   :  { %v262_v40 = vadd.f32 %v261_v39, %v257_v38 }
 0x241   :  { %v263_v41 = vadd.f32 %v262_v40, %v487_v26 }
 0x243   :  { %v264_v42 = vmax.f32 %v263_v41, 0.0 }
 0x245   :  { %265 = vst [vmem:[%s535_s5] sm:$0xff] %v264_v42 }

</bundles_post_ra>
